<compile_context>
chip_gen: v5e
topology: v5e:2x2
jax: 0.10.0
libtpu: 0.0.40
codegen_flags: <defaults>
</compile_context>

<pallas_src>
import math

import jax
import jax.numpy as jnp
from jax import lax
from jax.experimental import pallas as pl
from jax.experimental.pallas import tpu as pltpu


def _round_up(x: int, m: int) -> int:
    return (x + m - 1) // m * m


def _make_mlm_head_kernel(*, tn: int, layer_norm_eps: float, emit_logits: bool):
    # Plain Python floats only (jnp constants created outside the kernel would
    # be captured as jaxpr constants, which pallas_call rejects).
    eps = float(layer_norm_eps)
    inv_sqrt2 = float(1.0 / math.sqrt(2.0))

    def kernel(x_ref, w1_ref, b1_ref, gamma_ref, beta_ref, w2_ref, b2_ref, lab_ref,
               *outs_and_scratch):
        if emit_logits:
            (logits_ref, rowloss_ref, rowvalid_ref,
             h_ref, m_ref, l_ref, p_ref) = outs_and_scratch
        else:
            (rowloss_ref, rowvalid_ref,
             h_ref, m_ref, l_ref, p_ref) = outs_and_scratch

        j = pl.program_id(1)
        nj = pl.num_programs(1)

        # ---- dense -> GELU -> LayerNorm: once per token tile, cached ----
        @pl.when(j == 0)
        def _():
            x = x_ref[...]                                            # (TM, H) bf16
            h = jnp.dot(x, w1_ref[...], preferred_element_type=jnp.float32)
            h = h + b1_ref[...]
            # exact (erf) GELU, matching torch.nn.functional.gelu default
            h = 0.5 * h * (1.0 + lax.erf(h * inv_sqrt2))
            mu = jnp.mean(h, axis=-1, keepdims=True)
            d = h - mu
            var = jnp.mean(d * d, axis=-1, keepdims=True)
            h = d * lax.rsqrt(var + eps)
            h = h * gamma_ref[...] + beta_ref[...]
            h_ref[...] = h.astype(h_ref.dtype)                        # bf16 cache

        # ---- decoder tile: logits = h @ W2_t[:, j-tile] + b2[j-tile] ----
        # Padded vocab columns carry b2 = -1e30, so no in-kernel mask is needed.
        logits = jnp.dot(h_ref[...], w2_ref[...],
                         preferred_element_type=jnp.float32)
        logits = logits + b2_ref[...]                                 # (TM, TN) f32
        if emit_logits:
            logits_ref[...] = logits.astype(logits_ref.dtype)

        # ---- online cross-entropy (flash-style) over vocab tiles ----
        lab = lab_ref[...]                                            # (TM, 1) int32
        col = j * tn + lax.broadcasted_iota(jnp.int32, logits.shape, 1)
        tile_max = jnp.max(logits, axis=-1, keepdims=True)            # (TM, 1)
        picked = jnp.sum(jnp.where(col == lab, logits, 0.0),
                         axis=-1, keepdims=True)                      # (TM, 1)

        @pl.when(j == 0)
        def _():
            m_ref[...] = tile_max
            l_ref[...] = jnp.sum(jnp.exp(logits - tile_max), axis=-1, keepdims=True)
            p_ref[...] = picked

        @pl.when(j > 0)
        def _():
            m_old = m_ref[...]
            m_new = jnp.maximum(m_old, tile_max)
            alpha = jnp.exp(m_old - m_new)
            l_ref[...] = l_ref[...] * alpha + jnp.sum(
                jnp.exp(logits - m_new), axis=-1, keepdims=True)
            m_ref[...] = m_new
            p_ref[...] = p_ref[...] + picked

        # ---- finalize per-row loss on the last vocab tile ----
        @pl.when(j == nj - 1)
        def _():
            lse = m_ref[...] + jnp.log(l_ref[...])
            valid = (lab != -100).astype(jnp.float32)
            rowloss_ref[...] = (lse - p_ref[...]) * valid
            rowvalid_ref[...] = valid

    return kernel


def prepare_params(params, *, tn: int = 1024, compute_dtype=jnp.bfloat16):
    """One-time weight prep: transpose, pad vocab dim, cast matmul operands to bf16.

    Callers should cache the result and pass it as `prepared=` so the
    transpose/pad/cast HBM passes are not repeated on every forward call.
    """
    H = int(params["dense_w"].shape[0])
    V = int(params["decoder_b"].shape[0])
    TN = min(int(tn), _round_up(V, 128))
    Vp = _round_up(V, TN)
    return {
        "H": H, "V": V, "TN": TN, "Vp": Vp,
        "w1_t": params["dense_w"].T.astype(compute_dtype),            # (H, H)
        "b1": params["dense_b"].reshape(1, H).astype(jnp.float32),
        "gamma": params["ln_w"].reshape(1, H).astype(jnp.float32),
        "beta": params["ln_b"].reshape(1, H).astype(jnp.float32),
        # zero-padded decoder columns ...
        "w2_t": jnp.pad(params["decoder_w"].T.astype(compute_dtype),
                        ((0, 0), (0, Vp - V))),                       # (H, Vp)
        # ... with a huge negative bias so they drop out of max / LSE in-kernel.
        "b2": jnp.pad(params["decoder_b"].astype(jnp.float32), (0, Vp - V),
                      constant_values=-1e30).reshape(1, Vp),
    }


def pretrain_mlm_head(sequence_output, labels, params=None, *, prepared=None,
                      layer_norm_eps=1e-12, tm=512, tn=1024,
                      logits_dtype=jnp.bfloat16, return_logits=True):
    """sequence_output: (B, S, H) float; labels: (B, S) int (ignore_index=-100).

    If `prepared` (from prepare_params) is given, `params`/`tn` are ignored for
    weight prep and the cached pre-transposed bf16 weights are used directly.
    """
    if prepared is None:
        prepared = prepare_params(params, tn=tn)

    B, S, H = sequence_output.shape
    V, Vp, TN = prepared["V"], prepared["Vp"], prepared["TN"]
    N = B * S
    out_dtype = jnp.dtype(logits_dtype)

    # Token tile: biggest that fits, but keep >=2 tiles so the "parallel" token
    # axis can shard across v7x's 2 TensorCores.
    TM = min(int(tm), _round_up(N, 8))
    if TM >= N and N > 8:
        TM = _round_up((N + 1) // 2, 8)
    Np = _round_up(N, TM)
    nI, nJ = Np // TM, Vp // TN

    # ---- prepare activations/labels (pad only if needed) ----
    x = sequence_output.reshape(N, H)
    if Np != N:
        x = jnp.pad(x, ((0, Np - N), (0, 0)))
    x = x.astype(prepared["w1_t"].dtype)

    lab = labels.reshape(N).astype(jnp.int32)
    if Np != N:
        lab = jnp.pad(lab, (0, Np - N), constant_values=-100)
    lab = lab.reshape(Np, 1)

    kernel = _make_mlm_head_kernel(tn=TN, layer_norm_eps=layer_norm_eps,
                                   emit_logits=return_logits)

    # ---- VMEM budget (double-buffered inputs + scratch), capped for v7x ----
    cdt = 2                                   # bf16 compute operands
    vmem_est = 2 * (TM * H * cdt              # x tile
                    + H * H * cdt             # W1_t (resident, still 2-buffered)
                    + 3 * H * 4               # b1 / gamma / beta
                    + H * TN * cdt            # W2_t vocab tile (streamed)
                    + TN * 4                  # b2 tile
                    + TM * 4)                 # labels
    if return_logits:
        vmem_est += 2 * TM * TN * out_dtype.itemsize
    vmem_est += 2 * 2 * TM * 4                # row loss / valid outputs
    vmem_est += TM * H * cdt + 3 * TM * 4     # h cache + m/l/p scratch
    vmem_limit = int(min(max(int(1.5 * vmem_est) + (4 << 20), 32 << 20), 56 << 20))

    flops = 2.0 * Np * H * H + 2.0 * Np * H * Vp
    transcendentals = Np * H + Np * Vp
    bytes_accessed = (x.size * 2 + prepared["w1_t"].size * 2
                      + nI * prepared["w2_t"].size * 2
                      + (H * 3 + Vp) * 4 + Np * 4 + 2 * Np * 4)
    if return_logits:
        bytes_accessed += Np * Vp * out_dtype.itemsize

    in_specs = [
        pl.BlockSpec((TM, H), lambda i, j: (i, 0)),      # x tile
        pl.BlockSpec((H, H), lambda i, j: (0, 0)),       # W1_t (resident)
        pl.BlockSpec((1, H), lambda i, j: (0, 0)),       # dense bias
        pl.BlockSpec((1, H), lambda i, j: (0, 0)),       # LN gamma
        pl.BlockSpec((1, H), lambda i, j: (0, 0)),       # LN beta
        pl.BlockSpec((H, TN), lambda i, j: (0, j)),      # W2_t (vocab-streamed)
        pl.BlockSpec((1, TN), lambda i, j: (0, j)),      # decoder bias (-1e30 padded)
        pl.BlockSpec((TM, 1), lambda i, j: (i, 0)),      # labels
    ]

    out_specs = []
    out_shape = []
    if return_logits:
        out_specs.append(pl.BlockSpec((TM, TN), lambda i, j: (i, j)))
        out_shape.append(jax.ShapeDtypeStruct((Np, Vp), out_dtype))
    out_specs += [pl.BlockSpec((TM, 1), lambda i, j: (i, 0)),   # per-row loss*valid
                  pl.BlockSpec((TM, 1), lambda i, j: (i, 0))]   # per-row valid flag
    out_shape += [jax.ShapeDtypeStruct((Np, 1), jnp.float32),
                  jax.ShapeDtypeStruct((Np, 1), jnp.float32)]

    grid_spec = pltpu.PrefetchScalarGridSpec(
        num_scalar_prefetch=0,
        grid=(nI, nJ),
        in_specs=in_specs,
        out_specs=tuple(out_specs),
        scratch_shapes=[
            pltpu.VMEM((TM, H), jnp.bfloat16),   # cached LayerNorm(GELU(xW1+b1))
            pltpu.VMEM((TM, 1), jnp.float32),    # running max
            pltpu.VMEM((TM, 1), jnp.float32),    # running sum-exp
            pltpu.VMEM((TM, 1), jnp.float32),    # picked (label) logit
        ],
    )

    outs = pl.pallas_call(
        kernel,
        grid_spec=grid_spec,
        out_shape=tuple(out_shape),
        compiler_params=pltpu.CompilerParams(
            dimension_semantics=("parallel", "arbitrary"),
            vmem_limit_bytes=vmem_limit),
        cost_estimate=pl.CostEstimate(
            flops=int(flops),
            transcendentals=int(transcendentals),
            bytes_accessed=int(bytes_accessed)),
    )(x, prepared["w1_t"], prepared["b1"], prepared["gamma"], prepared["beta"],
      prepared["w2_t"], prepared["b2"], lab)

    if return_logits:
        logits_p, row_loss, row_valid = outs
    else:
        row_loss, row_valid = outs

    # torch CrossEntropyLoss(reduction='mean', ignore_index=-100) semantics:
    # mean over valid tokens; 0/0 -> NaN when every label is ignored.
    loss = jnp.sum(row_loss) / jnp.sum(row_valid)

    result = {"loss": loss}
    if return_logits:
        if Np != N or Vp != V:
            logits_p = logits_p[:N, :V]      # slice copy only when padding exists
        result["logits"] = logits_p.reshape(B, S, V)
    return result


def init_params(key, hidden_size, vocab_size):
    k1, k2 = jax.random.split(key, 2)
    scale_h = 1.0 / math.sqrt(hidden_size)
    return {
        "dense_w": jax.random.uniform(k1, (hidden_size, hidden_size),
                                      minval=-scale_h, maxval=scale_h,
                                      dtype=jnp.float32),
        "dense_b": jnp.zeros((hidden_size,), jnp.float32),
        "ln_w": jnp.ones((hidden_size,), jnp.float32),
        "ln_b": jnp.zeros((hidden_size,), jnp.float32),
        "decoder_w": jax.random.uniform(k2, (vocab_size, hidden_size),
                                        minval=-scale_h, maxval=scale_h,
                                        dtype=jnp.float32),
        "decoder_b": jnp.zeros((vocab_size,), jnp.float32),   # self.bias in the module
    }


def _reference(sequence_output, labels, params, eps):
    """Pure-JAX f32 reference of the PyTorch module (for a loose sanity check)."""
    x = sequence_output.astype(jnp.float32)
    h = jnp.einsum("bsh,oh->bso", x, params["dense_w"]) + params["dense_b"]
    h = 0.5 * h * (1.0 + lax.erf(h / jnp.sqrt(2.0)))
    mu = h.mean(-1, keepdims=True)
    var = ((h - mu) ** 2).mean(-1, keepdims=True)
    h = (h - mu) / jnp.sqrt(var + eps) * params["ln_w"] + params["ln_b"]
    logits = jnp.einsum("bsh,vh->bsv", h, params["decoder_w"]) + params["decoder_b"]
    V = logits.shape[-1]
    flat = logits.reshape(-1, V)
    lab = labels.reshape(-1)
    lse = jax.nn.logsumexp(flat, axis=-1)
    picked = jnp.take_along_axis(flat, jnp.clip(lab, 0)[:, None], axis=-1)[:, 0]
    valid = (lab != -100).astype(jnp.float32)
    loss = jnp.sum((lse - picked) * valid) / jnp.sum(valid)
    return {"loss": loss, "logits": logits}


if __name__ == "__main__":
    B, S, H, V = 2, 8, 32, 128
    key = jax.random.PRNGKey(0)
    kp, kx, kl = jax.random.split(key, 3)

    params = init_params(kp, H, V)
    sequence_output = jax.random.normal(kx, (B, S, H), dtype=jnp.float32)
    labels = jax.random.randint(kl, (B, S), 0, V, dtype=jnp.int32)
    labels = labels.at[0, 0].set(-100)   # exercise ignore_index path

    # Hoisted, cached weight prep (transpose / pad / bf16) — do once per model.
    prepared = prepare_params(params, tn=1024)

    out = pretrain_mlm_head(sequence_output, labels, prepared=prepared,
                            layer_norm_eps=1e-12)
    jax.block_until_ready(out["loss"])
    jax.block_until_ready(out["logits"])

    assert out["logits"].shape == (B, S, V)
    assert out["loss"].shape == ()

    # Loss-only mode (no N x V logits writeback at all).
    out_lo = pretrain_mlm_head(sequence_output, labels, prepared=prepared,
                               layer_norm_eps=1e-12, return_logits=False)
    jax.block_until_ready(out_lo["loss"])
    assert "logits" not in out_lo
    assert float(jnp.abs(out_lo["loss"] - out["loss"])) < 1e-5

    # Loose sanity check vs f32 reference (kernel uses bf16 MXU inputs + bf16 logits).
    ref = _reference(sequence_output, labels, params, 1e-12)
    assert bool(jnp.isfinite(out["loss"]))
    assert float(jnp.abs(out["loss"] - ref["loss"])) < 5e-2
    assert float(jnp.max(jnp.abs(out["logits"].astype(jnp.float32)
                                 - ref["logits"]))) < 2e-1

    print("KERNEL_OK")
</pallas_src>

<mosaic_0001>
module attributes {stable_mosaic.version = 11 : i64} {
  func.func @kernel(%arg0: i32, %arg1: i32, %arg2: memref<8x32xbf16, #tpu.memory_space<vmem>>, %arg3: memref<32x32xbf16, #tpu.memory_space<vmem>>, %arg4: memref<1x32xf32, #tpu.memory_space<vmem>>, %arg5: memref<1x32xf32, #tpu.memory_space<vmem>>, %arg6: memref<1x32xf32, #tpu.memory_space<vmem>>, %arg7: memref<32x128xbf16, #tpu.memory_space<vmem>>, %arg8: memref<1x128xf32, #tpu.memory_space<vmem>>, %arg9: memref<8x1xi32, #tpu.memory_space<vmem>>, %arg10: memref<8x128xbf16, #tpu.memory_space<vmem>>, %arg11: memref<8x1xf32, #tpu.memory_space<vmem>>, %arg12: memref<8x1xf32, #tpu.memory_space<vmem>>, %arg13: memref<8x32xbf16, #tpu.memory_space<vmem>>, %arg14: memref<8x1xf32, #tpu.memory_space<vmem>>, %arg15: memref<8x1xf32, #tpu.memory_space<vmem>>, %arg16: memref<8x1xf32, #tpu.memory_space<vmem>>) attributes {dimension_semantics = [#tpu.dimension_semantics<parallel>, #tpu.dimension_semantics<arbitrary>], iteration_bounds = array<i64: 2, 1>, scalar_prefetch = 0 : i64, scratch_operands = 4 : i64, tpu.core_type = #tpu.core_type<tc>, window_params = [{transform_indices = @transform_0, window_bounds = array<i64: 8, 32>}, {pipeline_mode = #tpu.pipeline_mode<synchronous>, transform_indices = @transform_1, window_bounds = array<i64: 32, 32>}, {pipeline_mode = #tpu.pipeline_mode<synchronous>, transform_indices = @transform_2, window_bounds = array<i64: 1, 32>}, {pipeline_mode = #tpu.pipeline_mode<synchronous>, transform_indices = @transform_3, window_bounds = array<i64: 1, 32>}, {pipeline_mode = #tpu.pipeline_mode<synchronous>, transform_indices = @transform_4, window_bounds = array<i64: 1, 32>}, {transform_indices = @transform_5, window_bounds = array<i64: 32, 128>}, {transform_indices = @transform_6, window_bounds = array<i64: 1, 128>}, {transform_indices = @transform_7, window_bounds = array<i64: 8, 1>}, {transform_indices = @transform_8, window_bounds = array<i64: 8, 128>}, {transform_indices = @transform_9, window_bounds = array<i64: 8, 1>}, {transform_indices = @transform_10, window_bounds = array<i64: 8, 1>}]} {
    %c0_i32 = arith.constant 0 : i32
    %0 = arith.cmpi eq, %arg1, %c0_i32 : i32
    %1 = arith.extui %0 : i1 to i32
    %c0_i32_0 = arith.constant 0 : i32
    %2 = arith.cmpi ne, %1, %c0_i32_0 : i32
    scf.if %2 {
      %c0_19 = arith.constant 0 : index
      %c0_20 = arith.constant 0 : index
      %33 = vector.load %arg2[%c0_19, %c0_20] : memref<8x32xbf16, #tpu.memory_space<vmem>>, vector<8x32xbf16>
      %c0_21 = arith.constant 0 : index
      %c0_22 = arith.constant 0 : index
      %34 = vector.load %arg3[%c0_21, %c0_22] : memref<32x32xbf16, #tpu.memory_space<vmem>>, vector<32x32xbf16>
      %cst_23 = arith.constant dense<0.000000e+00> : vector<8x32xf32>
      %35 = tpu.matmul %33, %34, %cst_23 {dimension_numbers = #tpu.dot_dimension_numbers<[1], [0], [0], [1], [0, 0, 1, 1], [], []>} : vector<8x32xbf16>, vector<32x32xbf16>, vector<8x32xf32> -> vector<8x32xf32>
      %c0_24 = arith.constant 0 : index
      %c0_25 = arith.constant 0 : index
      %36 = vector.load %arg4[%c0_24, %c0_25] : memref<1x32xf32, #tpu.memory_space<vmem>>, vector<1x32xf32>
      %37 = vector.broadcast %36 : vector<1x32xf32> to vector<8x32xf32>
      %38 = arith.addf %35, %37 : vector<8x32xf32>
      %cst_26 = arith.constant 5.000000e-01 : f32
      %39 = vector.broadcast %cst_26 : f32 to vector<8x32xf32>
      %40 = arith.mulf %39, %38 : vector<8x32xf32>
      %cst_27 = arith.constant 0.707106769 : f32
      %41 = vector.broadcast %cst_27 : f32 to vector<8x32xf32>
      %42 = arith.mulf %38, %41 : vector<8x32xf32>
      %43 = math.erf %42 : vector<8x32xf32>
      %cst_28 = arith.constant 1.000000e+00 : f32
      %44 = vector.broadcast %cst_28 : f32 to vector<8x32xf32>
      %45 = arith.addf %44, %43 : vector<8x32xf32>
      %46 = arith.mulf %40, %45 : vector<8x32xf32>
      %cst_29 = arith.constant dense<0.000000e+00> : vector<8xf32>
      %47 = vector.multi_reduction <add>, %46, %cst_29 [1] : vector<8x32xf32> to vector<8xf32>
      %48 = vector.shape_cast %47 : vector<8xf32> to vector<8x1xf32>
      %cst_30 = arith.constant 3.200000e+01 : f32
      %49 = vector.broadcast %cst_30 : f32 to vector<8x1xf32>
      %50 = arith.divf %48, %49 : vector<8x1xf32>
      %51 = vector.broadcast %50 : vector<8x1xf32> to vector<8x32xf32>
      %52 = arith.subf %46, %51 : vector<8x32xf32>
      %53 = arith.mulf %52, %52 : vector<8x32xf32>
      %cst_31 = arith.constant dense<0.000000e+00> : vector<8xf32>
      %54 = vector.multi_reduction <add>, %53, %cst_31 [1] : vector<8x32xf32> to vector<8xf32>
      %55 = vector.shape_cast %54 : vector<8xf32> to vector<8x1xf32>
      %cst_32 = arith.constant 3.200000e+01 : f32
      %56 = vector.broadcast %cst_32 : f32 to vector<8x1xf32>
      %57 = arith.divf %55, %56 : vector<8x1xf32>
      %cst_33 = arith.constant 9.99999996E-13 : f32
      %58 = vector.broadcast %cst_33 : f32 to vector<8x1xf32>
      %59 = arith.addf %57, %58 : vector<8x1xf32>
      %60 = math.rsqrt %59 : vector<8x1xf32>
      %61 = vector.broadcast %60 : vector<8x1xf32> to vector<8x32xf32>
      %62 = arith.mulf %52, %61 : vector<8x32xf32>
      %c0_34 = arith.constant 0 : index
      %c0_35 = arith.constant 0 : index
      %63 = vector.load %arg5[%c0_34, %c0_35] : memref<1x32xf32, #tpu.memory_space<vmem>>, vector<1x32xf32>
      %64 = vector.broadcast %63 : vector<1x32xf32> to vector<8x32xf32>
      %65 = arith.mulf %62, %64 : vector<8x32xf32>
      %c0_36 = arith.constant 0 : index
      %c0_37 = arith.constant 0 : index
      %66 = vector.load %arg6[%c0_36, %c0_37] : memref<1x32xf32, #tpu.memory_space<vmem>>, vector<1x32xf32>
      %67 = vector.broadcast %66 : vector<1x32xf32> to vector<8x32xf32>
      %68 = arith.addf %65, %67 : vector<8x32xf32>
      %69 = arith.truncf %68 : vector<8x32xf32> to vector<8x32xbf16>
      %c0_38 = arith.constant 0 : index
      %c0_39 = arith.constant 0 : index
      %70 = vector.load %arg13[%c0_38, %c0_39] : memref<8x32xbf16, #tpu.memory_space<vmem>>, vector<8x32xbf16>
      tpu.vector_store %arg13[%c0_38, %c0_39], %69 {strides = array<i32>} : memref<8x32xbf16, #tpu.memory_space<vmem>>, vector<8x32xbf16>,
    } else {
    }
    %c0 = arith.constant 0 : index
    %c0_1 = arith.constant 0 : index
    %3 = vector.load %arg13[%c0, %c0_1] : memref<8x32xbf16, #tpu.memory_space<vmem>>, vector<8x32xbf16>
    %c0_2 = arith.constant 0 : index
    %c0_3 = arith.constant 0 : index
    %4 = vector.load %arg7[%c0_2, %c0_3] : memref<32x128xbf16, #tpu.memory_space<vmem>>, vector<32x128xbf16>
    %cst = arith.constant dense<0.000000e+00> : vector<8x128xf32>
    %5 = tpu.matmul %3, %4, %cst {dimension_numbers = #tpu.dot_dimension_numbers<[1], [0], [0], [1], [0, 0, 1, 1], [], []>} : vector<8x32xbf16>, vector<32x128xbf16>, vector<8x128xf32> -> vector<8x128xf32>
    %c0_4 = arith.constant 0 : index
    %c0_5 = arith.constant 0 : index
    %6 = vector.load %arg8[%c0_4, %c0_5] : memref<1x128xf32, #tpu.memory_space<vmem>>, vector<1x128xf32>
    %7 = vector.broadcast %6 : vector<1x128xf32> to vector<8x128xf32>
    %8 = arith.addf %5, %7 : vector<8x128xf32>
    %9 = arith.truncf %8 : vector<8x128xf32> to vector<8x128xbf16>
    %c0_6 = arith.constant 0 : index
    %c0_7 = arith.constant 0 : index
    %10 = vector.load %arg10[%c0_6, %c0_7] : memref<8x128xbf16, #tpu.memory_space<vmem>>, vector<8x128xbf16>
    tpu.vector_store %arg10[%c0_6, %c0_7], %9 {strides = array<i32>} : memref<8x128xbf16, #tpu.memory_space<vmem>>, vector<8x128xbf16>,
    %c0_8 = arith.constant 0 : index
    %c0_9 = arith.constant 0 : index
    %11 = vector.load %arg9[%c0_8, %c0_9] : memref<8x1xi32, #tpu.memory_space<vmem>>, vector<8x1xi32>
    %c128_i32 = arith.constant 128 : i32
    %12 = arith.muli %arg1, %c128_i32 : i32
    %13 = tpu.iota {dimensions = array<i32: 1>} : vector<8x128xi32>
    %14 = vector.broadcast %12 : i32 to vector<8x128xi32>
    %15 = arith.addi %14, %13 : vector<8x128xi32>
    %cst_10 = arith.constant dense<0xFF800000> : vector<8xf32>
    %16 = vector.multi_reduction <maximumf>, %8, %cst_10 [1] : vector<8x128xf32> to vector<8xf32>
    %17 = vector.shape_cast %16 : vector<8xf32> to vector<8x1xf32>
    %18 = vector.broadcast %11 : vector<8x1xi32> to vector<8x128xi32>
    %19 = arith.cmpi eq, %15, %18 : vector<8x128xi32>
    %cst_11 = arith.constant 0.000000e+00 : f32
    %20 = vector.broadcast %cst_11 : f32 to vector<8x128xf32>
    %21 = arith.select %19, %8, %20 : vector<8x128xi1>, vector<8x128xf32>
    %cst_12 = arith.constant dense<0.000000e+00> : vector<8xf32>
    %22 = vector.multi_reduction <add>, %21, %cst_12 [1] : vector<8x128xf32> to vector<8xf32>
    %23 = vector.shape_cast %22 : vector<8xf32> to vector<8x1xf32>
    %c0_i32_13 = arith.constant 0 : i32
    %24 = arith.cmpi eq, %arg1, %c0_i32_13 : i32
    %25 = arith.extui %24 : i1 to i32
    %c0_i32_14 = arith.constant 0 : i32
    %26 = arith.cmpi ne, %25, %c0_i32_14 : i32
    scf.if %26 {
      %c0_19 = arith.constant 0 : index
      %c0_20 = arith.constant 0 : index
      %33 = vector.load %arg14[%c0_19, %c0_20] : memref<8x1xf32, #tpu.memory_space<vmem>>, vector<8x1xf32>
      tpu.vector_store %arg14[%c0_19, %c0_20], %17 {strides = array<i32>} : memref<8x1xf32, #tpu.memory_space<vmem>>, vector<8x1xf32>,
      %34 = vector.broadcast %17 : vector<8x1xf32> to vector<8x128xf32>
      %35 = arith.subf %8, %34 : vector<8x128xf32>
      %36 = math.exp %35 : vector<8x128xf32>
      %cst_21 = arith.constant dense<0.000000e+00> : vector<8xf32>
      %37 = vector.multi_reduction <add>, %36, %cst_21 [1] : vector<8x128xf32> to vector<8xf32>
      %38 = vector.shape_cast %37 : vector<8xf32> to vector<8x1xf32>
      %c0_22 = arith.constant 0 : index
      %c0_23 = arith.constant 0 : index
      %39 = vector.load %arg15[%c0_22, %c0_23] : memref<8x1xf32, #tpu.memory_space<vmem>>, vector<8x1xf32>
      tpu.vector_store %arg15[%c0_22, %c0_23], %38 {strides = array<i32>} : memref<8x1xf32, #tpu.memory_space<vmem>>, vector<8x1xf32>,
      %c0_24 = arith.constant 0 : index
      %c0_25 = arith.constant 0 : index
      %40 = vector.load %arg16[%c0_24, %c0_25] : memref<8x1xf32, #tpu.memory_space<vmem>>, vector<8x1xf32>
      tpu.vector_store %arg16[%c0_24, %c0_25], %23 {strides = array<i32>} : memref<8x1xf32, #tpu.memory_space<vmem>>, vector<8x1xf32>,
    } else {
    }
    %c0_i32_15 = arith.constant 0 : i32
    %27 = arith.cmpi sgt, %arg1, %c0_i32_15 : i32
    %28 = arith.extui %27 : i1 to i32
    %c0_i32_16 = arith.constant 0 : i32
    %29 = arith.cmpi ne, %28, %c0_i32_16 : i32
    scf.if %29 {
      %c0_19 = arith.constant 0 : index
      %c0_20 = arith.constant 0 : index
      %33 = vector.load %arg14[%c0_19, %c0_20] : memref<8x1xf32, #tpu.memory_space<vmem>>, vector<8x1xf32>
      %34 = arith.maximumf %33, %17 : vector<8x1xf32>
      %35 = arith.subf %33, %34 : vector<8x1xf32>
      %36 = math.exp %35 : vector<8x1xf32>
      %c0_21 = arith.constant 0 : index
      %c0_22 = arith.constant 0 : index
      %37 = vector.load %arg15[%c0_21, %c0_22] : memref<8x1xf32, #tpu.memory_space<vmem>>, vector<8x1xf32>
      %38 = arith.mulf %37, %36 : vector<8x1xf32>
      %39 = vector.broadcast %34 : vector<8x1xf32> to vector<8x128xf32>
      %40 = arith.subf %8, %39 : vector<8x128xf32>
      %41 = math.exp %40 : vector<8x128xf32>
      %cst_23 = arith.constant dense<0.000000e+00> : vector<8xf32>
      %42 = vector.multi_reduction <add>, %41, %cst_23 [1] : vector<8x128xf32> to vector<8xf32>
      %43 = vector.shape_cast %42 : vector<8xf32> to vector<8x1xf32>
      %44 = arith.addf %38, %43 : vector<8x1xf32>
      %c0_24 = arith.constant 0 : index
      %c0_25 = arith.constant 0 : index
      %45 = vector.load %arg15[%c0_24, %c0_25] : memref<8x1xf32, #tpu.memory_space<vmem>>, vector<8x1xf32>
      tpu.vector_store %arg15[%c0_24, %c0_25], %44 {strides = array<i32>} : memref<8x1xf32, #tpu.memory_space<vmem>>, vector<8x1xf32>,
      %c0_26 = arith.constant 0 : index
      %c0_27 = arith.constant 0 : index
      %46 = vector.load %arg14[%c0_26, %c0_27] : memref<8x1xf32, #tpu.memory_space<vmem>>, vector<8x1xf32>
      tpu.vector_store %arg14[%c0_26, %c0_27], %34 {strides = array<i32>} : memref<8x1xf32, #tpu.memory_space<vmem>>, vector<8x1xf32>,
      %c0_28 = arith.constant 0 : index
      %c0_29 = arith.constant 0 : index
      %47 = vector.load %arg16[%c0_28, %c0_29] : memref<8x1xf32, #tpu.memory_space<vmem>>, vector<8x1xf32>
      %48 = arith.addf %47, %23 : vector<8x1xf32>
      %c0_30 = arith.constant 0 : index
      %c0_31 = arith.constant 0 : index
      %49 = vector.load %arg16[%c0_30, %c0_31] : memref<8x1xf32, #tpu.memory_space<vmem>>, vector<8x1xf32>
      tpu.vector_store %arg16[%c0_30, %c0_31], %48 {strides = array<i32>} : memref<8x1xf32, #tpu.memory_space<vmem>>, vector<8x1xf32>,
    } else {
    }
    %c0_i32_17 = arith.constant 0 : i32
    %30 = arith.cmpi eq, %arg1, %c0_i32_17 : i32
    %31 = arith.extui %30 : i1 to i32
    %c0_i32_18 = arith.constant 0 : i32
    %32 = arith.cmpi ne, %31, %c0_i32_18 : i32
    scf.if %32 {
      %c0_19 = arith.constant 0 : index
      %c0_20 = arith.constant 0 : index
      %33 = vector.load %arg14[%c0_19, %c0_20] : memref<8x1xf32, #tpu.memory_space<vmem>>, vector<8x1xf32>
      %c0_21 = arith.constant 0 : index
      %c0_22 = arith.constant 0 : index
      %34 = vector.load %arg15[%c0_21, %c0_22] : memref<8x1xf32, #tpu.memory_space<vmem>>, vector<8x1xf32>
      %35 = math.log %34 : vector<8x1xf32>
      %36 = arith.addf %33, %35 : vector<8x1xf32>
      %c-100_i32 = arith.constant -100 : i32
      %37 = vector.broadcast %c-100_i32 : i32 to vector<8x1xi32>
      %38 = arith.cmpi ne, %11, %37 : vector<8x1xi32>
      %39 = arith.extui %38 : vector<8x1xi1> to vector<8x1xi32>
      %40 = arith.sitofp %39 : vector<8x1xi32> to vector<8x1xf32>
      %c0_23 = arith.constant 0 : index
      %c0_24 = arith.constant 0 : index
      %41 = vector.load %arg16[%c0_23, %c0_24] : memref<8x1xf32, #tpu.memory_space<vmem>>, vector<8x1xf32>
      %42 = arith.subf %36, %41 : vector<8x1xf32>
      %43 = arith.mulf %42, %40 : vector<8x1xf32>
      %c0_25 = arith.constant 0 : index
      %c0_26 = arith.constant 0 : index
      %44 = vector.load %arg11[%c0_25, %c0_26] : memref<8x1xf32, #tpu.memory_space<vmem>>, vector<8x1xf32>
      tpu.vector_store %arg11[%c0_25, %c0_26], %43 {strides = array<i32>} : memref<8x1xf32, #tpu.memory_space<vmem>>, vector<8x1xf32>,
      %c0_27 = arith.constant 0 : index
      %c0_28 = arith.constant 0 : index
      %45 = vector.load %arg12[%c0_27, %c0_28] : memref<8x1xf32, #tpu.memory_space<vmem>>, vector<8x1xf32>
      tpu.vector_store %arg12[%c0_27, %c0_28], %40 {strides = array<i32>} : memref<8x1xf32, #tpu.memory_space<vmem>>, vector<8x1xf32>,
    } else {
    }
    return
  }
  func.func @transform_0(%arg0: i32, %arg1: i32) -> (i32, i32) {
    %c0_i32 = arith.constant 0 : i32
    %c0_i32_0 = arith.constant 0 : i32
    return %arg0, %c0_i32 : i32, i32
  }
  func.func @transform_1(%arg0: i32, %arg1: i32) -> (i32, i32) {
    %c0_i32 = arith.constant 0 : i32
    %c0_i32_0 = arith.constant 0 : i32
    %c0_i32_1 = arith.constant 0 : i32
    return %c0_i32, %c0_i32_0 : i32, i32
  }
  func.func @transform_2(%arg0: i32, %arg1: i32) -> (i32, i32) {
    %c0_i32 = arith.constant 0 : i32
    %c0_i32_0 = arith.constant 0 : i32
    %c0_i32_1 = arith.constant 0 : i32
    return %c0_i32, %c0_i32_0 : i32, i32
  }
  func.func @transform_3(%arg0: i32, %arg1: i32) -> (i32, i32) {
    %c0_i32 = arith.constant 0 : i32
    %c0_i32_0 = arith.constant 0 : i32
    %c0_i32_1 = arith.constant 0 : i32
    return %c0_i32, %c0_i32_0 : i32, i32
  }
  func.func @transform_4(%arg0: i32, %arg1: i32) -> (i32, i32) {
    %c0_i32 = arith.constant 0 : i32
    %c0_i32_0 = arith.constant 0 : i32
    %c0_i32_1 = arith.constant 0 : i32
    return %c0_i32, %c0_i32_0 : i32, i32
  }
  func.func @transform_5(%arg0: i32, %arg1: i32) -> (i32, i32) {
    %c0_i32 = arith.constant 0 : i32
    %c0_i32_0 = arith.constant 0 : i32
    return %c0_i32, %arg1 : i32, i32
  }
  func.func @transform_6(%arg0: i32, %arg1: i32) -> (i32, i32) {
    %c0_i32 = arith.constant 0 : i32
    %c0_i32_0 = arith.constant 0 : i32
    return %c0_i32, %arg1 : i32, i32
  }
  func.func @transform_7(%arg0: i32, %arg1: i32) -> (i32, i32) {
    %c0_i32 = arith.constant 0 : i32
    %c0_i32_0 = arith.constant 0 : i32
    return %arg0, %c0_i32 : i32, i32
  }
  func.func @transform_8(%arg0: i32, %arg1: i32) -> (i32, i32) {
    %c0_i32 = arith.constant 0 : i32
    return %arg0, %arg1 : i32, i32
  }
  func.func @transform_9(%arg0: i32, %arg1: i32) -> (i32, i32) {
    %c0_i32 = arith.constant 0 : i32
    %c0_i32_0 = arith.constant 0 : i32
    return %arg0, %c0_i32 : i32, i32
  }
  func.func @transform_10(%arg0: i32, %arg1: i32) -> (i32, i32) {
    %c0_i32 = arith.constant 0 : i32
    %c0_i32_0 = arith.constant 0 : i32
    return %arg0, %c0_i32 : i32, i32
  }
}

</mosaic_0001>

<bundles_post_ra>
// kernel: tpu_custom_call.1
= control target key start
LH: loop header
LB: loop body
LE: loop exit
PB: predicated region body
PF: predicated region fallthrough
CT: control target
= control target key end

     0   :  { %s1438_s0 = inlined_call_operand.hbm [shape: bf16[16,32], index: 0, kind: input, shape index: {}]   ;;  %s1439_s1 = inlined_call_operand.vmem [shape: bf16[32,32], index: 1, kind: input, shape index: {}]   ;;  %s1440_s2 = inlined_call_operand.vmem [shape: f32[1,32], index: 2, kind: input, shape index: {}]   ;;  %s1441_s3 = inlined_call_operand.vmem [shape: f32[1,32], index: 3, kind: input, shape index: {}]   ;;  %s1442_s4 = inlined_call_operand.vmem [shape: f32[1,32], index: 4, kind: input, shape index: {}]   ;;  %s1443_s5 = inlined_call_operand.hbm [shape: bf16[32,128], index: 5, kind: input, shape index: {}]   ;;  %s1444_s6 = inlined_call_operand.vmem [shape: f32[1,128], index: 6, kind: input, shape index: {}]   ;;  %s1445_s7 = inlined_call_operand.vmem [shape: s32[16,1], index: 7, kind: input, shape index: {}]   ;;  %s1446_s8 = inlined_call_operand.hbm [shape: bf16[16,128], index: 8, kind: output, shape index: {0}]   ;;  %s1447_s9 = inlined_call_operand.vmem [shape: f32[16,1], index: 9, kind: output, shape index: {1}]   ;;  %s1448_s10 = inlined_call_operand.vmem [shape: f32[16,1], index: 10, kind: output, shape index: {2}]  }
   0x1   :  { %1451 = sst [smem:[#allocation18_spill]] %s1443_s5 }
   0x2   :  { %1452 = sst [smem:[#allocation19_spill]] %s1447_s9 }
   0x3   :  { %16 = vsyncpa [#allocation7], 0 }
   0x4   :  { %18 = vsyncpa [#allocation7 + $0x1], 0 }
   0x5   :  { %19 = vsyncpa [#allocation10], 0 }
   0x6   :  { %20 = vsyncpa [#allocation8], 0 }
   0x7   :  { %22 = vsyncpa [#allocation8 + $0x1], 0  ;;  %s1248_s13 = smov 0   ;;  %s1250_s14 = smov 0  }
   0x8   :  { %s1252_s15 = smov 0   ;;  %s1254_s16 = smov 0  }
   0x9   :  { %s1256_s17 = smov 0   ;;  %s1258_s18 = smov 0  }
   0xa LB: > { %1453 = sst [smem:[#allocation15_spill]] %s1165_s13  ;;  %s902_s19 = sadd.s32 4294967295, %s1185_s18   ;;  %s1185_s18 = sphi %s1258_s18, %s28_s18   ;;  %s1181_s17 = sphi %s1256_s17, %s1471_s17   ;;  %s1177_s16 = sphi %s1254_s16, %s1470_s16   ;;  %s1173_s15 = sphi %s1252_s15, %s1469_s15   ;;  %s1169_s14 = sphi %s1250_s14, %s1468_s14   ;;  %s1165_s13 = sphi %s1248_s13, %s1467_s13  }
   0xb   : > { %p904_p0 = scmp.ge.s32.totalorder %s1185_s18, 1  ;;  %p1280_p1 = scmp.eq.s32.totalorder %s902_s19, 0 }
   0xc   : > { %p313_p2 = scmp.lt.s32.totalorder %s1185_s18, 3  ;;  %s1455_s5 = sld [smem:[#allocation18_spill]] }
   0xd   : > { %s1187_s25 = smov [#allocation9]   ;;  %p907_p6 = scmp.ge.s32.totalorder %s1185_s18, 2 }
   0xe   : > { %p1288_p3 = pnand %p904_p0, %p313_p2  ;;  %s340_s26 = sshll.u32 %s1187_s25, 4  ;;  %s341_s26 = int_to_ptr.vmem [resolvable:$true] %s340_s26 }
   0xf   : > { %s1188_s27 = smov 64   ;;  %s1189_s28 = smov 4  }
  0x10   : > { %p953_p4 = pneg %p1288_p3  ;;  %s903_s29 = sadd.s32 4294967294, %s1185_s18  }
  0x11   : > { %s40_s30 = sadd.s32 1, %s1181_s17  ;;  %s47_s11 = sadd.s32 1, %s1173_s15 }
  0x12   : > { %s338_s23 = sshll.u32 %s1455_s5, 4  ;;  %p954_p5 = pnand %p953_p4, %p1280_p1  ;;  %s339_s23 = int_to_ptr.hbm [resolvable:$true] %s338_s23 }
  0x13   : > { %p42_p7 = scmp.ge.s32.totalorder %s40_s30, 2  ;;  %p54_p8 = scmp.ne.s32.totalorder %s1173_s15, %s1169_s14 }
  0x14   : > { %956 = dma.hbm_to_vmem [thread:$0]  (!%p954_p5), %s339_s23, 256, %s341_s26, [#allocation10], %s1188_s27, %s1188_s27, %s1189_s28  }
  0x15   : > { %p55_p9 = scmp.eq.s32.totalorder %s1185_s18, 0  ;;  %p60_p10 = scmp.ne.s32.totalorder %s1169_s14, %s1165_s13 }
  0x16   : > { %s1473_s30 = smov (%p42_p7, %s40_s30), 0  ;;  %p248_p13 = scmp.eq.s32.totalorder %s902_s19, 1 }
  0x17   : > { %1457 = sst [smem:[#allocation16_spill]] %s1473_s30  ;;  %p1307_p11 = por %p55_p9, %p54_p8 }
  0x18   : > { %p1313_p12 = por %p1280_p1, %p60_p10  ;;  %s44_s22 = ssub.s32 %s1181_s17, %s1473_s30 }
  0x19   : > { %p45_p0 = scmp.eq.s32.totalorder %s44_s22, 0  ;;  %p254_p2 = scmp.eq.s32.totalorder %s903_s29, 1 }
  0x1a   : > { %p1319_p4 = por %p248_p13, %p54_p8  ;;  %p966_p5 = scmp.lt.s32.totalorder %s1185_s18, 2 }
  0x1b   : > { %s1325_s25 = scalar_select %p45_p0, %s1173_s15, %s47_s11  }
  0x1c   : > { %p1327_p7 = por %p254_p2, %p60_p10  ;;  %s360_s27 = sand.u32 1, %s1173_s15  }
  0x1d   : > { %1461 = sst [smem:[#allocation17_spill]] %s1325_s25  ;;  %s908_s28 = sshll.u32 %s360_s27, 2 }
  0x1e   : > { %s909_s5 = sshll.u32 %s1181_s17, 2  ;;  %s364_s22 = scalar_lea.vmem [#allocation6], %s908_s28 }
  0x1f   : > { %s368_s19 = scalar_lea.hbm %s1438_s0, %s909_s5  ;;  %s372_s29 = sshll.u32 %s364_s22, 4  ;;  %s373_s29 = int_to_ptr.vmem [resolvable:$true] %s372_s29 }
  0x20   : > { %s370_s9 = sshll.u32 %s368_s19, 4  ;;  %p958_p8 = pnand %p966_p5, %p1307_p11  ;;  %s371_s9 = int_to_ptr.hbm [resolvable:$true] %s370_s9 }
  0x21   : > { %s361_s11 = scalar_lea.sflag [#allocation7], %s360_s27  ;;  %388 = sbr.rel (%p1288_p3) target bundleno = 905 (0x389), region = 52 }
  0x22   : > { %960 = dma.hbm_to_vmem [thread:$0]  (!%p958_p8), %s371_s9, 64, %s373_s29, %s361_s11  }
  0x23   : > { %s1341_s25 = sand.u32 (!%p1288_p3), 1, %s1169_s14  }
  0x24   : > { %s911_s5 = sshll.u32 (!%p1288_p3), %s1341_s25, 2  ;;  %s391_s13 = scalar_lea.sflag (!%p1288_p3), [#allocation7], %s1341_s25 }
  0x25   : > { %s394_s30 = scalar_lea.vmem (!%p1288_p3), [#allocation6], %s911_s5 }
  0x26   : > { %1152 = dma.done.wait (%p1313_p12), %s391_s13, 64  }
  0x27   : > { %1154 = vsyncadd (%p1313_p12), %s391_s13, 4294967232 }
  0x28   : > { %1156 = dma.done.wait (%p1280_p1), [#allocation10], 256  }
  0x29   : > { %1158 = vsyncadd (%p1280_p1), [#allocation10], 4294967040  ;;  %v942_v0 = vld [vmem:[%s1439_s1 + $0x8] sm:$0xff]  ;;  %v941_v1 = vld [vmem:[%s1439_s1] sm:$0xff]  ;;  %vm493_vm0 = vcmask 261120   ;;  %v1190_v47 = vmov 32.0  }
  0x2a   : > { %503 = vmatpush.bf16.msra.mxu0 %v942_v0  ;;  %v472_v2 = vld [vmem:[%s394_s30] sm:$0xf]  ;;  %v944_v59 = vld [vmem:[#allocation9 + $0x8] sm:$0xff]  ;;  %v943_v62 = vld [vmem:[#allocation9] sm:$0xff]  ;;  %vm594_vm9 = vcmask 257024   ;;  %p455_p1 = scmp.lt.s32.totalorder %s1177_s16, 1 }
  0x2b   : > { %v1025_v3 = vld [vmem:[%s1440_s2] ss:$0 sm:$0xff]  ;;  %627 = vmatpush.bf16.msra.mxu1 %v944_v59  ;;  %vm654_vm11 = vcmask 7168   ;;  %s439_s19 = scalar_lea.vmem [#allocation11], %s911_s5  ;;  %s938_s22 = sshll.u32 %s1177_s16, 2 }
  0x2c   : > { %s456_s11 = scalar_select %p455_p1, %s1177_s16, 1 }
  0x2d   : > { %s730_s30 = sshll.u32 %s439_s19, 4  ;;  %s1119_s28 = scalar_lea.hbm %s1446_s8, 8  ;;  %s731_s30 = int_to_ptr.vmem [resolvable:$true] %s730_s30 }
  0x2e   : > { %504 = vmatpush.bf16.msra.mxu0 %v941_v1  ;;  %s1376_s13 = sshll.u32 %s456_s11, 3  ;;  %s728_s11 = scalar_lea.hbm %s1446_s8, %s938_s22 }
  0x2f   : > { %628 = vmatpush.bf16.msra.mxu1 %v943_v62  ;;  %s458_s24 = scalar_lea.vmem %s1445_s7, %s1376_s13  ;;  %s466_s21 = scalar_lea.vmem %s1448_s10, %s1376_s13 }
  0x30   : > { %s732_s9 = sshll.u32 %s728_s11, 4  ;;  %s733_s9 = int_to_ptr.hbm [resolvable:$true] %s732_s9 }
  0x31   : > { %925 = vmatmul.msk.bf16.vlgmr.msra.gmra.mxu0 %vm493_vm0, %v472_v2  ;;  %s1113_s12 = sshra.s32 %s733_s9, 4  ;;  %s1114_s12 = int_to_ptr.hbm [resolvable:$true] %s1113_s12 }
  0x32   : > { %s1115_s27 = scalar_lea.hbm %s1114_s12, 4  ;;  %p1120_p11 = scmp.lt.s32.totalorder %s1114_s12, %s1446_s8 }
  0x33   : > { %p1116_p3 = scmp.ne.s32.totalorder %s1114_s12, %s1115_s27  ;;  %p1121_p12 = scmp.lt.s32.totalorder %s1119_s28, %s1115_s27 }
  0x35   : > { %p1117_p9 = pnand %p1116_p3, %p1319_p4  ;;  %p1122_p13 = por %p1121_p12, %p1120_p11 }
  0x37   : > { %p1118_p10 = pneg %p1117_p9 }
  0x39   : > { %p1123_p0 = pnand %p1122_p13, %p1118_p10 }
  0xae   : > { %v506_v4 = vpop.f32.mrf.mxu0 }
  0xaf   : > { %v507_v5 = vadd.f32 %v1025_v3, %v506_v4 }
  0xb1   : > { %v511_v6 = vmul.f32 0.70710677, %v507_v5  ;;  %v510_v43 = vmul.f32 0.5, %v507_v5 }
  0xb3   : > { %v512_v7 = vmul.f32 %v511_v6, %v511_v6 }
  0xb5   : > { %v513_v8 = vmin.f32 %v512_v7, 16.0 }
  0xb6   : > { %v508_v9 = vpop.f32.mrf.mxu0 }
  0xb7   : > { %v514_v10 = vmul.f32 2.1237322e-06, %v513_v8  ;;  %v525_v11 = vmul.f32 3.8918573e-05, %v513_v8 }
  0xb9   : > { %v515_v12 = vadd.f32 0.00028619796, %v514_v10  ;;  %v526_v13 = vadd.f32 0.001143296, %v525_v11 }
  0xbb   : > { %v516_v14 = vmul.f32 %v515_v12, %v513_v8  ;;  %v527_v15 = vmul.f32 %v526_v13, %v513_v8 }
  0xbd   : > { %v528_v16 = vadd.f32 0.014752088, %v527_v15  ;;  %v517_v17 = vadd.f32 0.0036580483, %v516_v14  ;;  %v636_v14 = vld [vmem:[%s458_s24] sm:$0xff]  ;;  %v1191_v15 = vmov 0  }
  0xbe   : > { %1023 = vset.pattern.permute.xlu1 %v1191_v15  ;;  %vm699_vm10 = vcmp.ne.s32.totalorder %v636_v14, 4294967196  ;;  %1024 = vset.pattern.permute.xlu0 %v1191_v15  ;;  %s709_s24 = scalar_lea.sflag [#allocation8], %s1341_s25 }
  0xbf   : > { %v529_v18 = vmul.f32 %v528_v16, %v513_v8  ;;  %v518_v20 = vmul.f32 %v517_v17, %v513_v8  ;;  %v1192_v16 = vmov 0.0  }
  0xc0   : > { %v936_v17 = vsel %vm699_vm10, 1.0, %v1192_v16 }
  0xc1   : > { %v530_v19 = vadd.f32 0.112945676, %v529_v18  ;;  %v519_v23 = vadd.f32 0.05243302, %v518_v20  ;;  %707 = vst.msk [vmem:[%s466_s21] sm:$0xff] %vm654_vm11, %v936_v17 }
  0xc2   : > { %v1028_v18 = vld [vmem:[%s1444_s6] ss:$0 sm:$0xff] }
  0xc3   : > { %v531_v21 = vmul.f32 %v530_v19, %v513_v8  ;;  %v520_v26 = vmul.f32 %v519_v23, %v513_v8 }
  0xc5   : > { %v532_v22 = vadd.f32 0.4994258, %v531_v21  ;;  %v521_v27 = vadd.f32 0.18741608, %v520_v26 }
  0xc7   : > { %v533_v24 = vmul.f32 %v532_v22, %v513_v8  ;;  %v522_v29 = vmul.f32 %v521_v27, %v513_v8  ;;  %v1027_v8 = vld [vmem:[%s1442_s4] ss:$0 sm:$0xff]  ;;  %v638_v27 = vlaneseq }
  0xc9   : > { %v534_v25 = vadd.f32 1.0, %v533_v24  ;;  %v523_v33 = vadd.f32 1.1283791, %v522_v29 }
  0xcb   : > { %1029 = vrcp.f32 %v534_v25  ;;  %v546_v32 = vand.u32 2147483648, %v534_v25  ;;  %v544_v35 = vand.u32 2147483647, %v534_v25  ;;  %vm540_vm2 = vweird.f32 %v534_v25 }
  0xcc   : > { %v524_v38 = vmul.f32 %v523_v33, %v511_v6  ;;  %1031 = vrcp.f32 %v1190_v47  ;;  %v1026_v6 = vld [vmem:[%s1441_s3] ss:$0 sm:$0xff] }
  0xcd   : > { %v547_v37 = vor.u32 1.1754944e-38, %v546_v32  ;;  %vm545_vm4 = vcmp.eq.f32.partialorder %v544_v35, 8.507059e+37 }
  0xd1   : > { %v1030_v28 = vpop.eup %1029 }
  0xd2   : > { %v536_v30 = vmul.f32 %v1030_v28, %v534_v25  ;;  %vm541_vm1 = vweird.f32 %v1030_v28  ;;  %v1032_v48 = vpop.eup %1031 }
  0xd3   : > { %vm542_vm3 = vmor %vm540_vm2, %vm541_vm1  ;;  %v558_v49 = vmul.f32 32.0, %v1032_v48  ;;  %vm562_vm5 = vweird.f32 %v1032_v48 }
  0xd4   : > { %v537_v31 = vsub.f32 1.0, %v536_v30 }
  0xd5   : > { %v559_v50 = vsub.f32 1.0, %v558_v49 }
  0xd6   : > { %v538_v34 = vmul.f32 %v1030_v28, %v537_v31 }
  0xd7   : > { %v560_v51 = vmul.f32 %v1032_v48, %v559_v50 }
  0xd8   : > { %v539_v36 = vadd.f32 %v1030_v28, %v538_v34 }
  0xd9   : > { %v561_v52 = vadd.f32 %v1032_v48, %v560_v51 }
  0xda   : > { %v543_v39 = vsel %vm542_vm3, %v1030_v28, %v539_v36  ;;  %v639_v28 = vand.u32 127, %v638_v27 }
  0xdb   : > { %v548_v40 = vsel %vm545_vm4, %v547_v37, %v543_v39  ;;  %v563_v53 = vsel %vm562_vm5, %v1032_v48, %v561_v52 }
  0xdc   : > { %v549_v41 = vmul.f32 %v548_v40, %v524_v38 }
  0xde   : > { %v926_v42 = vclamps-f32 %v549_v41, 1.0 }
  0xe0   : > { %v552_v44 = vadd.f32 1.0, %v926_v42 }
  0xe2   : > { %v553_v45 = vmul.f32 %v552_v44, %v510_v43 }
  0xe4   : > { %v554_v46 = vsel %vm493_vm0, %v553_v45, 0.0 }
  0xe5   : > { %555 = vadd.xlane.f32.xlu0 %v554_v46 }
 0x158   : > { %v556_v54 = vpop.xlane.xlu0 %555 }
 0x159   : > { %v564_v55 = vmul.f32 %v563_v53, %v556_v54 }
 0x15b   : > { %v565_v56 = vsub.f32 %v553_v45, %v564_v55 }
 0x15d   : > { %v566_v57 = vmul.f32 %v565_v56, %v565_v56 }
 0x15f   : > { %v567_v58 = vsel %vm493_vm0, %v566_v57, 0.0 }
 0x160   : > { %568 = vadd.xlane.f32.xlu0 %v567_v58 }
 0x1d3   : > { %v569_v60 = vpop.xlane.xlu0 %568 }
 0x1d4   : > { %v570_v61 = vmul.f32 %v569_v60, %v563_v53 }
 0x1d6   : > { %v571_v63 = vadd.f32 1e-12, %v570_v61 }
 0x1d8   : > { %1033 = vrsqrt.f32 %v571_v63  ;;  %vm578_vm7 = vweird.f32 %v571_v63 }
 0x1de   : > { %v1034_v0 = vpop.eup %1033 }
 0x1df   : > { %v573_v1 = vmul.f32 %v1034_v0, %v571_v63  ;;  %vm579_vm6 = vweird.f32 %v1034_v0 }
 0x1e0   : > { %vm580_vm8 = vmor %vm578_vm7, %vm579_vm6 }
 0x1e1   : > { %v574_v2 = vmul.f32 %v1034_v0, %v573_v1 }
 0x1e3   : > { %v575_v3 = vmul.f32 0.5, %v574_v2 }
 0x1e5   : > { %v576_v4 = vsub.f32 1.5, %v575_v3 }
 0x1e7   : > { %v577_v5 = vmul.f32 %v1034_v0, %v576_v4 }
 0x1e9   : > { %v581_v7 = vsel %vm580_vm8, %v1034_v0, %v577_v5 }
 0x1ea   : > { %v582_v9 = vmul.f32 %v581_v7, %v565_v56 }
 0x1ec   : > { %v587_v10 = vmul.f32 %v1026_v6, %v582_v9 }
 0x1ee   : > { %v592_v11 = vadd.f32 %v1027_v8, %v587_v10 }
 0x1f0   : > { %v593_v12 = vpack.c.bf16 %v592_v11, %v592_v11 }
 0x1f2   : > { %595 = vst.msk [vmem:[#allocation2] sm:$0xf] %vm594_vm9, %v593_v12 }
 0x1f9   : > { %v596_v13 = vld [vmem:[#allocation2] sm:$0xf] }
 0x1fa   : > { %935 = vmatmul.msk.bf16.vlgmr.msra.gmra.mxu1 %vm493_vm0, %v596_v13 }
 0x277   : > { %v630_v19 = vpop.f32.mrf.mxu1 }
 0x278   : > { %v631_v20 = vadd.f32 %v1028_v18, %v630_v19 }
 0x27a   : > { %v634_v21 = vpack.c.bf16 %v631_v20, %v631_v20  ;;  %642 = vmax.xlane.f32.xlu1 %v631_v20 }
 0x27c   : > { %635 = vst [vmem:[%s439_s19] sm:$0xf] %v634_v21 }
 0x27f   : > { %v632_v22 = vpop.f32.mrf.mxu1 }
 0x293   : > { %645 = vperm.xlu1 %1023, %v636_v14  }
 0x2ed   : > { %v643_v23 = vpop.xlane.xlu1 %642 }
 0x2ee   : > { %655 = vst.msk [vmem:[#allocation3] sm:$0xff] %vm654_vm11, %v643_v23  ;;  %v656_v24 = vsub.f32 %v631_v20, %v643_v23 }
 0x2f0   : > { %v657_v25 = vmul.f32 1.442695, %v656_v24 }
 0x2f2   : > { %1035 = vpow2.f32 %v657_v25 }
 0x2f8   : > { %v1036_v26 = vpop.eup %1035 }
 0x2f9   : > { %659 = vadd.xlane.f32.xlu2 %v1036_v26 }
 0x305   : > { %v646_v29 = vpop.permute.xlu1 %645 }
 0x306   : > { %vm647_vm12 = vcmp.eq.s32.totalorder %v639_v28, %v646_v29 }
 0x307   : > { %v648_v30 = vsel %vm647_vm12, %v631_v20, 0.0 }
 0x308   : > { %649 = vadd.xlane.f32.xlu2 %v648_v30 }
 0x309   : > { %1126 = shalt.err (!%p1123_p0)
}
 0x30a   : > { %951 = dma.vmem_to_hbm [thread:$0]  (%p1319_p4), %s731_s30, 64, %s733_s9, %s709_s24   ;;  %v694_v36 = vld [vmem:[#allocation3] sm:$0xff] }
 0x30b   : > { %s1463_s29 = sld [smem:[#allocation19_spill]] }
 0x311   : > { %s462_s23 = scalar_lea.vmem %s1463_s29, %s1376_s13 }
 0x36c   : > { %v660_v31 = vpop.xlane.xlu2 %659 }
 0x36d   : > { %661 = vst.msk [vmem:[#allocation4] sm:$0xff] %vm654_vm11, %v660_v31 }
 0x374   : > { %v695_v32 = vld [vmem:[#allocation4] sm:$0xff] }
 0x375   : > { %1037 = vlog2.f32 %v695_v32 }
 0x37b   : > { %v1038_v33 = vpop.eup %1037  ;;  %v650_v34 = vpop.xlane.xlu2 %649 }
 0x37c   : > { %662 = vst.msk [vmem:[#allocation5] sm:$0xff] %vm654_vm11, %v650_v34  ;;  %v697_v35 = vmul.f32 0.6931472, %v1038_v33 }
 0x37e   : > { %v698_v37 = vadd.f32 %v697_v35, %v694_v36 }
 0x383   : > { %v702_v38 = vld [vmem:[#allocation5] sm:$0xff] }
 0x384   : > { %v703_v39 = vsub.f32 %v698_v37, %v702_v38 }
 0x386   : > { %v704_v40 = vmul.f32 %v936_v17, %v703_v39 }
 0x388   : > { %706 = vst.msk [vmem:[%s462_s23] sm:$0xff] %vm654_vm11, %v704_v40 }
 0x389 PF: > { %s1464_s5 = sld [smem:[#allocation15_spill]]  ;;  %p962_p2 = pnand %p907_p6, %p1327_p7 }
 0x38b   : > { %p963_p4 = pneg %p962_p2 }
 0x38f   : > { %s750_s11 = sand.u32 1, %s1464_s5  }
 0x390   : > { %s751_s30 = scalar_lea.sflag [#allocation8], %s750_s11 }
 0x391   : > { %1160 = dma.done.wait (%p963_p4), %s751_s30, 64  }
 0x392   : > { %1162 = vsyncadd (%p963_p4), %s751_s30, 4294967232  ;;  %s28_s18 = sadd.s32 1, %s1185_s18   ;;  %s1465_s9 = sld [smem:[#allocation17_spill]] }
 0x393   : > { %p25_p5 = scmp.ge.s32.totalorder %s28_s18, 4   ;;  %s1466_s24 = sld [smem:[#allocation16_spill]] }
 0x394   : > { %s1467_s13 = smov %s1169_s14  ;;  %s1468_s14 = smov %s1173_s15 }
 0x395   : > { %s1470_s16 = smov %s1181_s17  ;;  %27 = sbr.rel (!%p25_p5) target bundleno = 10 (0xa), region = 148 }
 0x398   : > { %s1469_s15 = smov %s1465_s9 }
 0x399   : > { %s1471_s17 = smov %s1466_s24 }
 0x39a   :  { %771 = vsyncpa [#allocation7], 1 }
 0x39b   :  { %773 = vsyncpa [#allocation7 + $0x1], 1 }
 0x39c   :  { %774 = vsyncpa [#allocation10], 1 }
 0x39d   :  { %775 = vsyncpa [#allocation8], 1 }
 0x39e   :  { %777 = vsyncpa [#allocation8 + $0x1], 1 }

</bundles_post_ra>
